<compile_context>
chip_gen: v7x
topology: tpu7x:2x2x1
jax: 0.10.0
libtpu: 0.0.40
codegen_flags: <defaults>
</compile_context>

<pallas_src>
import functools

import jax
import jax.numpy as jnp
from jax import lax
from jax.experimental import pallas as pl
from jax.experimental.pallas import tpu as pltpu


def _round_up(x, m):
    return ((x + m - 1) // m) * m


def _supcon_lse_kernel(feat_row_ref, feat_col_ref, lse_ref, m_sc, l_sc,
                       *, inv_temp, tm, tk, n_pad_cols, operand_dtype):
    i = pl.program_id(0)          # anchor-row tile          ("parallel")
    k = pl.program_id(1)          # contrast-column tile     ("arbitrary" / reduction)

    @pl.when(k == 0)
    def _init():
        m_sc[...] = jnp.full_like(m_sc, -jnp.inf)
        l_sc[...] = jnp.zeros_like(l_sc)

    # Fold 1/temperature into the small [TM, D] anchor tile in f32, then (optionally)
    # cast to the MXU operand dtype.
    a_scaled = feat_row_ref[...] * jnp.float32(inv_temp)
    a_op = a_scaled if operand_dtype is None else a_scaled.astype(operand_dtype)
    b_op = feat_col_ref[...]
    # adc[r, c] = <a_op[r, :], b_op[c, :]> : contraction on the lane axis of both
    # operands -> MXU directly (no in-kernel transpose), f32 accumulation.
    adc = lax.dot_general(a_op, b_op,
                          dimension_numbers=(((1,), (1,)), ((), ())),
                          preferred_element_type=jnp.float32)        # [TM, TK] f32

    # Online (flash-style) log-sum-exp.  The running max may safely include the self
    # column and padded zero columns (the shift cancels algebraically); only the
    # exp-sum has to exclude them.
    m_prev = m_sc[...]
    m_new = jnp.maximum(m_prev, jnp.max(adc, axis=1, keepdims=True))
    alpha = jnp.exp(m_prev - m_new)
    p = jnp.exp(adc - m_new)                                         # [TM, TK]
    m_sc[...] = m_new

    # Self-contrast exclusion only on the tile(s) intersecting the diagonal.
    is_diag = jnp.logical_and(i * tm < (k + 1) * tk, k * tk < (i + 1) * tm)

    @pl.when(is_diag)
    def _():
        row_g = i * tm + lax.broadcasted_iota(jnp.int32, (tm, 1), 0)
        col_g = k * tk + lax.broadcasted_iota(jnp.int32, (1, tk), 1)
        p_nd = jnp.where(row_g == col_g, 0.0, p)     # implicit broadcast to [TM, TK]
        l_sc[...] = alpha * l_sc[...] + jnp.sum(p_nd, axis=1, keepdims=True)

    @pl.when(jnp.logical_not(is_diag))
    def _():
        l_sc[...] = alpha * l_sc[...] + jnp.sum(p, axis=1, keepdims=True)

    @pl.when(k == pl.num_programs(1) - 1)
    def _finalize():
        m_f = m_sc[...]
        l_f = l_sc[...]
        if n_pad_cols:
            # Padded contrast features are exactly zero -> their logits are exactly 0
            # -> total padded exp-sum contribution is n_pad * exp(-m).  Correct once
            # here instead of masking every step.
            l_f = l_f - jnp.float32(n_pad_cols) * jnp.exp(-m_f)
        # TODO(synk): if reused with unnormalized features / much smaller temperature,
        # a row whose real logits all underflow could make l_f <= 0 here (latent edge
        # case; with L2-normalized features and temperature 0.07 logits are bounded).
        lse_ref[...] = m_f + jnp.log(l_f)


def supcon_loss(features, labels, higher_level_losses=None,
                temperature=0.07, base_temperature=0.07,
                matmul_dtype=None, tm=None, tk=None):
    """Pallas implementation of SupConLoss.forward.

    features: [bsz, n_views, ...]  (extra dims flattened into the feature dim)
    labels:   [bsz] integer class labels
    higher_level_losses: optional [n_views, bsz]
    matmul_dtype: optional dtype (e.g. jnp.bfloat16) for the A @ A.T operands; the
                  1/temperature scale and all softmax/LSE math stay in float32.
    tm, tk: optional tile-size overrides (tm multiple of 8, tk multiple of 128).
    Returns (losses [n_views, bsz], loss scalar), matching the PyTorch module.
    """
    if features.ndim < 3:
        raise ValueError("`features` needs to be [bsz, n_views, ...]")
    if features.ndim > 3:
        features = features.reshape(features.shape[0], features.shape[1], -1)

    bsz, n_views, D = features.shape
    labels = labels.reshape(-1)
    if labels.shape[0] != bsz:
        raise ValueError("Num of labels does not match num of features")
    N = bsz * n_views

    # contrast_feature = torch.cat(torch.unbind(features, dim=1), dim=0) -> view-major [N, D]
    contrast = jnp.concatenate(
        [features[:, v, :] for v in range(n_views)], axis=0).astype(jnp.float32)
    big_labels = jnp.tile(labels.astype(jnp.int32), n_views)               # [N]

    # ---- Label-only / O(N*D) statistics, hoisted out of the kernel ----
    # Compact relabeling via sort (no assumption on the label value range) so the
    # per-class scatter-adds have static shapes.
    order = jnp.argsort(big_labels)
    sorted_lab = big_labels[order]
    seg_start = jnp.concatenate(
        [jnp.zeros((1,), jnp.int32),
         (sorted_lab[1:] != sorted_lab[:-1]).astype(jnp.int32)])
    compact = jnp.zeros((N,), jnp.int32).at[order].set(jnp.cumsum(seg_start))
    counts = jnp.zeros((N,), jnp.float32).at[compact].add(1.0)
    class_sum = jnp.zeros((N, D), jnp.float32).at[compact].add(contrast)   # [N, D]
    mask_sum = counts[compact] - 1.0                                        # positives / anchor
    sq_norm = jnp.sum(contrast * contrast, axis=1)
    # spos_i = sum_{j != i, same label} logit_ij  (exact f32, O(N*D))
    spos = (jnp.sum(contrast * class_sum[compact], axis=1) - sq_norm) / float(temperature)

    # ---- Tile selection (8/128 layout constraints; padded cols corrected in-kernel,
    #      padded rows dropped after the call) ----
    if tm is None:
        tm = min(256, _round_up(N, 8))
        # v7x has 2 TensorCores: make sure the parallel row axis has >= 2 tiles
        # whenever N allows it so both cores get work.
        if _round_up(N, tm) // tm < 2 and N > 8:
            tm = _round_up((N + 1) // 2, 8)
    if tk is None:
        # VMEM is barely used; large contrast tiles amortize the ~0.35us/step grid
        # overhead.  Capped at 2048 so the f32 [TM,TK] temporaries stay well under the
        # v7x 64 MiB VMEM (and well under 128 MiB on v5e/v6e).
        tk = min(2048, _round_up(N, 128))
    n_pad_m = _round_up(N, tm)
    n_pad_k = _round_up(N, tk)

    feat_rows = jnp.pad(contrast, ((0, n_pad_m - N), (0, 0)))              # f32 anchors
    cols = contrast if matmul_dtype is None else contrast.astype(matmul_dtype)
    feat_cols = jnp.pad(cols, ((0, n_pad_k - N), (0, 0)))
    grid = (n_pad_m // tm, n_pad_k // tk)

    kernel = functools.partial(
        _supcon_lse_kernel,
        inv_temp=1.0 / float(temperature), tm=tm, tk=tk,
        n_pad_cols=n_pad_k - N, operand_dtype=matmul_dtype)

    bytes_in = feat_rows.size * 4 + feat_cols.size * feat_cols.dtype.itemsize * grid[0]
    cost = pl.CostEstimate(flops=2 * n_pad_m * n_pad_k * D,
                           transcendentals=n_pad_m * n_pad_k,
                           bytes_accessed=int(bytes_in) + n_pad_m * 4)

    lse_col = pl.pallas_call(
        kernel,
        out_shape=jax.ShapeDtypeStruct((n_pad_m, 1), jnp.float32),
        grid_spec=pltpu.PrefetchScalarGridSpec(
            num_scalar_prefetch=0,
            grid=grid,
            in_specs=[pl.BlockSpec((tm, D), lambda i, k: (i, 0)),   # anchor rows (f32)
                      pl.BlockSpec((tk, D), lambda i, k: (k, 0))],  # contrast cols
            out_specs=pl.BlockSpec((tm, 1), lambda i, k: (i, 0)),
            scratch_shapes=[pltpu.VMEM((tm, 1), jnp.float32),       # running max
                            pltpu.VMEM((tm, 1), jnp.float32)]),     # running exp-sum
        compiler_params=pltpu.CompilerParams(
            dimension_semantics=("parallel", "arbitrary"),
            vmem_limit_bytes=48 * 1024 * 1024),
        cost_estimate=cost,
    )(feat_rows, feat_cols)

    lse = lse_col[:N, 0]

    # ---- O(N) epilogue in plain JAX: sum(mask*log_prob) = spos - mask_sum * lse ----
    mean_log_prob_pos = jnp.where(
        mask_sum > 0.0, (spos - mask_sum * lse) / (mask_sum + 1e-6), 0.0)
    losses = (-(float(temperature) / float(base_temperature))
              * mean_log_prob_pos).reshape(n_views, bsz)
    if higher_level_losses is not None:
        losses = jnp.maximum(losses, jnp.asarray(higher_level_losses, losses.dtype))
    n_nonzero = jnp.sum((mask_sum > 0.0).astype(jnp.float32))
    loss = losses.sum() / n_nonzero
    return losses, loss


def _supcon_loss_ref(features, labels, higher_level_losses=None,
                     temperature=0.07, base_temperature=0.07):
    """Pure-JAX reference (direct port of the PyTorch module) for verification."""
    if features.ndim > 3:
        features = features.reshape(features.shape[0], features.shape[1], -1)
    bsz, n_views, _ = features.shape
    labels = labels.reshape(-1, 1)
    mask = (labels == labels.T).astype(jnp.float32)
    contrast_feature = jnp.concatenate(
        [features[:, v, :] for v in range(n_views)], axis=0)
    adc = jnp.matmul(contrast_feature, contrast_feature.T,
                     precision=jax.lax.Precision.HIGHEST) / temperature
    logits = adc - jnp.max(adc, axis=1, keepdims=True)
    mask = jnp.tile(mask, (n_views, n_views))
    N = bsz * n_views
    logits_mask = 1.0 - jnp.eye(N, dtype=jnp.float32)
    mask = mask * logits_mask
    exp_logits = jnp.exp(logits) * logits_mask
    log_prob = logits - jnp.log(exp_logits.sum(1, keepdims=True))
    mean_log_prob_pos = (mask * log_prob).sum(1) / (mask.sum(1) + 1e-6)
    loss = -(temperature / base_temperature) * mean_log_prob_pos
    losses = loss.reshape(n_views, bsz)
    if higher_level_losses is not None:
        losses = jnp.maximum(losses, higher_level_losses)
    n_nonzero = jnp.sum((mask.sum(1) > 0).astype(jnp.float32))
    return losses, losses.sum() / n_nonzero


if __name__ == "__main__":
    key = jax.random.PRNGKey(0)
    kf, kl = jax.random.split(key)

    # Small case: bsz=8, n_views=2, D=32 (N=16 -> two row tiles of 8, padded columns).
    bsz, n_views, D = 8, 2, 32
    features = jax.random.normal(kf, (bsz, n_views, D), dtype=jnp.float32)
    features = features / jnp.linalg.norm(features, axis=-1, keepdims=True)
    labels = jax.random.randint(kl, (bsz,), 0, 4, dtype=jnp.int32)

    losses, loss = supcon_loss(features, labels)
    jax.block_until_ready((losses, loss))
    losses_ref, loss_ref = _supcon_loss_ref(features, labels)
    assert jnp.allclose(losses, losses_ref, rtol=1e-4, atol=1e-4)
    assert jnp.allclose(loss, loss_ref, rtol=1e-4, atol=1e-4)

    # Same case with higher_level_losses.
    khl = jax.random.fold_in(key, 1)
    hll = jax.random.uniform(khl, (n_views, bsz), dtype=jnp.float32) * 4.0
    losses_h, loss_h = supcon_loss(features, labels, higher_level_losses=hll)
    jax.block_until_ready((losses_h, loss_h))
    losses_h_ref, loss_h_ref = _supcon_loss_ref(features, labels, higher_level_losses=hll)
    assert jnp.allclose(losses_h, losses_h_ref, rtol=1e-4, atol=1e-4)
    assert jnp.allclose(loss_h, loss_h_ref, rtol=1e-4, atol=1e-4)

    # Multi-row-tile case: bsz=384, n_views=2, D=64 -> N=768.
    kf2, kl2 = jax.random.split(jax.random.fold_in(key, 2))
    bsz2, nv2, D2 = 384, 2, 64
    feats2 = jax.random.normal(kf2, (bsz2, nv2, D2), dtype=jnp.float32)
    feats2 = feats2 / jnp.linalg.norm(feats2, axis=-1, keepdims=True)
    labels2 = jax.random.randint(kl2, (bsz2,), 0, 8, dtype=jnp.int32)
    losses2_ref, loss2_ref = _supcon_loss_ref(feats2, labels2)

    # Default tiles: grid (3, 1) — single VMEM-resident contrast tile.
    losses2, loss2 = supcon_loss(feats2, labels2)
    jax.block_until_ready((losses2, loss2))
    assert jnp.allclose(losses2, losses2_ref, rtol=1e-3, atol=1e-3)
    assert jnp.allclose(loss2, loss2_ref, rtol=1e-3, atol=1e-3)

    # Forced tk=512: grid (3, 2) — exercises online-LSE accumulation across contrast
    # tiles plus the finalize-time padded-column correction.
    losses3, loss3 = supcon_loss(feats2, labels2, tk=512)
    jax.block_until_ready((losses3, loss3))
    assert jnp.allclose(losses3, losses2_ref, rtol=1e-3, atol=1e-3)
    assert jnp.allclose(loss3, loss2_ref, rtol=1e-3, atol=1e-3)

    # bf16 MXU operands (f32 scaling + f32 accumulation): loose sanity check.
    losses_bf, loss_bf = supcon_loss(feats2, labels2, matmul_dtype=jnp.bfloat16)
    jax.block_until_ready((losses_bf, loss_bf))
    assert bool(jnp.all(jnp.isfinite(losses_bf)))
    assert float(jnp.max(jnp.abs(losses_bf - losses2_ref))) < 0.75
    assert float(jnp.abs(loss_bf - loss2_ref)) < 0.25

    print("KERNEL_OK")
</pallas_src>

<mosaic_0001>
module attributes {stable_mosaic.version = 11 : i64} {
  func.func @_supcon_lse_kernel(%arg0: i32, %arg1: i32, %arg2: memref<8x32xf32, #tpu.memory_space<vmem>>, %arg3: memref<128x32xf32, #tpu.memory_space<vmem>>, %arg4: memref<8x1xf32, #tpu.memory_space<vmem>>, %arg5: memref<8x1xf32, #tpu.memory_space<vmem>>, %arg6: memref<8x1xf32, #tpu.memory_space<vmem>>) attributes {dimension_semantics = [#tpu.dimension_semantics<parallel>, #tpu.dimension_semantics<arbitrary>], iteration_bounds = array<i64: 2, 1>, scalar_prefetch = 0 : i64, scratch_operands = 2 : i64, tpu.core_type = #tpu.core_type<tc>, window_params = [{transform_indices = @transform_0, window_bounds = array<i64: 8, 32>}, {transform_indices = @transform_1, window_bounds = array<i64: 128, 32>}, {transform_indices = @transform_2, window_bounds = array<i64: 8, 1>}]} {
    %c0_i32 = arith.constant 0 : i32
    %0 = arith.cmpi eq, %arg1, %c0_i32 : i32
    %1 = arith.extui %0 : i1 to i32
    %c0_i32_0 = arith.constant 0 : i32
    %2 = arith.cmpi ne, %1, %c0_i32_0 : i32
    scf.if %2 {
      %cst_17 = arith.constant 0xFF800000 : f32
      %35 = vector.broadcast %cst_17 : f32 to vector<8x1xf32>
      %c0_18 = arith.constant 0 : index
      %c0_19 = arith.constant 0 : index
      %36 = vector.load %arg5[%c0_18, %c0_19] : memref<8x1xf32, #tpu.memory_space<vmem>>, vector<8x1xf32>
      tpu.vector_store %arg5[%c0_18, %c0_19], %35 {strides = array<i32>} : memref<8x1xf32, #tpu.memory_space<vmem>>, vector<8x1xf32>,
      %cst_20 = arith.constant 0.000000e+00 : f32
      %37 = vector.broadcast %cst_20 : f32 to vector<8x1xf32>
      %c0_21 = arith.constant 0 : index
      %c0_22 = arith.constant 0 : index
      %38 = vector.load %arg6[%c0_21, %c0_22] : memref<8x1xf32, #tpu.memory_space<vmem>>, vector<8x1xf32>
      tpu.vector_store %arg6[%c0_21, %c0_22], %37 {strides = array<i32>} : memref<8x1xf32, #tpu.memory_space<vmem>>, vector<8x1xf32>,
    } else {
    }
    %c0 = arith.constant 0 : index
    %c0_1 = arith.constant 0 : index
    %3 = vector.load %arg2[%c0, %c0_1] : memref<8x32xf32, #tpu.memory_space<vmem>>, vector<8x32xf32>
    %cst = arith.constant 14.2857141 : f32
    %4 = vector.broadcast %cst : f32 to vector<8x32xf32>
    %5 = arith.mulf %3, %4 : vector<8x32xf32>
    %c0_2 = arith.constant 0 : index
    %c0_3 = arith.constant 0 : index
    %6 = vector.load %arg3[%c0_2, %c0_3] : memref<128x32xf32, #tpu.memory_space<vmem>>, vector<128x32xf32>
    %cst_4 = arith.constant dense<0.000000e+00> : vector<8x128xf32>
    %7 = tpu.matmul %5, %6, %cst_4 {dimension_numbers = #tpu.dot_dimension_numbers<[1], [1], [0], [0], [0, 0, 1, 0], [], []>} : vector<8x32xf32>, vector<128x32xf32>, vector<8x128xf32> -> vector<8x128xf32>
    %c0_5 = arith.constant 0 : index
    %c0_6 = arith.constant 0 : index
    %8 = vector.load %arg5[%c0_5, %c0_6] : memref<8x1xf32, #tpu.memory_space<vmem>>, vector<8x1xf32>
    %cst_7 = arith.constant dense<0xFF800000> : vector<8xf32>
    %9 = vector.multi_reduction <maximumf>, %7, %cst_7 [1] : vector<8x128xf32> to vector<8xf32>
    %10 = vector.shape_cast %9 : vector<8xf32> to vector<8x1xf32>
    %11 = arith.maximumf %8, %10 : vector<8x1xf32>
    %12 = arith.subf %8, %11 : vector<8x1xf32>
    %13 = math.exp %12 : vector<8x1xf32>
    %14 = vector.broadcast %11 : vector<8x1xf32> to vector<8x128xf32>
    %15 = arith.subf %7, %14 : vector<8x128xf32>
    %16 = math.exp %15 : vector<8x128xf32>
    %c0_8 = arith.constant 0 : index
    %c0_9 = arith.constant 0 : index
    %17 = vector.load %arg5[%c0_8, %c0_9] : memref<8x1xf32, #tpu.memory_space<vmem>>, vector<8x1xf32>
    tpu.vector_store %arg5[%c0_8, %c0_9], %11 {strides = array<i32>} : memref<8x1xf32, #tpu.memory_space<vmem>>, vector<8x1xf32>,
    %c8_i32 = arith.constant 8 : i32
    %18 = arith.muli %arg0, %c8_i32 : i32
    %c1_i32 = arith.constant 1 : i32
    %19 = arith.addi %arg1, %c1_i32 : i32
    %c128_i32 = arith.constant 128 : i32
    %20 = arith.muli %19, %c128_i32 : i32
    %21 = arith.cmpi slt, %18, %20 : i32
    %c128_i32_10 = arith.constant 128 : i32
    %22 = arith.muli %arg1, %c128_i32_10 : i32
    %c1_i32_11 = arith.constant 1 : i32
    %23 = arith.addi %arg0, %c1_i32_11 : i32
    %c8_i32_12 = arith.constant 8 : i32
    %24 = arith.muli %23, %c8_i32_12 : i32
    %25 = arith.cmpi slt, %22, %24 : i32
    %26 = arith.andi %21, %25 : i1
    %27 = arith.extui %26 : i1 to i32
    %c0_i32_13 = arith.constant 0 : i32
    %28 = arith.cmpi ne, %27, %c0_i32_13 : i32
    scf.if %28 {
      %c8_i32_17 = arith.constant 8 : i32
      %35 = arith.muli %arg0, %c8_i32_17 : i32
      %36 = tpu.iota {dimensions = array<i32: 0>} : vector<8x1xi32>
      %37 = vector.broadcast %35 : i32 to vector<8x1xi32>
      %38 = arith.addi %37, %36 : vector<8x1xi32>
      %c128_i32_18 = arith.constant 128 : i32
      %39 = arith.muli %arg1, %c128_i32_18 : i32
      %40 = tpu.iota {dimensions = array<i32: 1>} : vector<1x128xi32>
      %41 = vector.broadcast %39 : i32 to vector<1x128xi32>
      %42 = arith.addi %41, %40 : vector<1x128xi32>
      %43 = vector.broadcast %38 : vector<8x1xi32> to vector<8x128xi32>
      %44 = vector.broadcast %42 : vector<1x128xi32> to vector<8x128xi32>
      %45 = arith.cmpi eq, %43, %44 : vector<8x128xi32>
      %cst_19 = arith.constant 0.000000e+00 : f32
      %46 = vector.broadcast %cst_19 : f32 to vector<8x128xf32>
      %47 = arith.select %45, %46, %16 : vector<8x128xi1>, vector<8x128xf32>
      %c0_20 = arith.constant 0 : index
      %c0_21 = arith.constant 0 : index
      %48 = vector.load %arg6[%c0_20, %c0_21] : memref<8x1xf32, #tpu.memory_space<vmem>>, vector<8x1xf32>
      %49 = arith.mulf %13, %48 : vector<8x1xf32>
      %cst_22 = arith.constant dense<0.000000e+00> : vector<8xf32>
      %50 = vector.multi_reduction <add>, %47, %cst_22 [1] : vector<8x128xf32> to vector<8xf32>
      %51 = vector.shape_cast %50 : vector<8xf32> to vector<8x1xf32>
      %52 = arith.addf %49, %51 : vector<8x1xf32>
      %c0_23 = arith.constant 0 : index
      %c0_24 = arith.constant 0 : index
      %53 = vector.load %arg6[%c0_23, %c0_24] : memref<8x1xf32, #tpu.memory_space<vmem>>, vector<8x1xf32>
      tpu.vector_store %arg6[%c0_23, %c0_24], %52 {strides = array<i32>} : memref<8x1xf32, #tpu.memory_space<vmem>>, vector<8x1xf32>,
    } else {
    }
    %true = arith.constant true
    %29 = arith.xori %26, %true : i1
    %30 = arith.extui %29 : i1 to i32
    %c0_i32_14 = arith.constant 0 : i32
    %31 = arith.cmpi ne, %30, %c0_i32_14 : i32
    scf.if %31 {
      %c0_17 = arith.constant 0 : index
      %c0_18 = arith.constant 0 : index
      %35 = vector.load %arg6[%c0_17, %c0_18] : memref<8x1xf32, #tpu.memory_space<vmem>>, vector<8x1xf32>
      %36 = arith.mulf %13, %35 : vector<8x1xf32>
      %cst_19 = arith.constant dense<0.000000e+00> : vector<8xf32>
      %37 = vector.multi_reduction <add>, %16, %cst_19 [1] : vector<8x128xf32> to vector<8xf32>
      %38 = vector.shape_cast %37 : vector<8xf32> to vector<8x1xf32>
      %39 = arith.addf %36, %38 : vector<8x1xf32>
      %c0_20 = arith.constant 0 : index
      %c0_21 = arith.constant 0 : index
      %40 = vector.load %arg6[%c0_20, %c0_21] : memref<8x1xf32, #tpu.memory_space<vmem>>, vector<8x1xf32>
      tpu.vector_store %arg6[%c0_20, %c0_21], %39 {strides = array<i32>} : memref<8x1xf32, #tpu.memory_space<vmem>>, vector<8x1xf32>,
    } else {
    }
    %c0_i32_15 = arith.constant 0 : i32
    %32 = arith.cmpi eq, %arg1, %c0_i32_15 : i32
    %33 = arith.extui %32 : i1 to i32
    %c0_i32_16 = arith.constant 0 : i32
    %34 = arith.cmpi ne, %33, %c0_i32_16 : i32
    scf.if %34 {
      %c0_17 = arith.constant 0 : index
      %c0_18 = arith.constant 0 : index
      %35 = vector.load %arg5[%c0_17, %c0_18] : memref<8x1xf32, #tpu.memory_space<vmem>>, vector<8x1xf32>
      %c0_19 = arith.constant 0 : index
      %c0_20 = arith.constant 0 : index
      %36 = vector.load %arg6[%c0_19, %c0_20] : memref<8x1xf32, #tpu.memory_space<vmem>>, vector<8x1xf32>
      %cst_21 = arith.constant 0.000000e+00 : f32
      %37 = vector.broadcast %cst_21 : f32 to vector<8x1xf32>
      %38 = arith.subf %37, %35 : vector<8x1xf32>
      %39 = math.exp %38 : vector<8x1xf32>
      %cst_22 = arith.constant 1.120000e+02 : f32
      %40 = vector.broadcast %cst_22 : f32 to vector<8x1xf32>
      %41 = arith.mulf %40, %39 : vector<8x1xf32>
      %42 = arith.subf %36, %41 : vector<8x1xf32>
      %43 = math.log %42 : vector<8x1xf32>
      %44 = arith.addf %35, %43 : vector<8x1xf32>
      %c0_23 = arith.constant 0 : index
      %c0_24 = arith.constant 0 : index
      %45 = vector.load %arg4[%c0_23, %c0_24] : memref<8x1xf32, #tpu.memory_space<vmem>>, vector<8x1xf32>
      tpu.vector_store %arg4[%c0_23, %c0_24], %44 {strides = array<i32>} : memref<8x1xf32, #tpu.memory_space<vmem>>, vector<8x1xf32>,
    } else {
    }
    return
  }
  func.func @transform_0(%arg0: i32, %arg1: i32) -> (i32, i32) {
    %c0_i32 = arith.constant 0 : i32
    %c0_i32_0 = arith.constant 0 : i32
    return %arg0, %c0_i32 : i32, i32
  }
  func.func @transform_1(%arg0: i32, %arg1: i32) -> (i32, i32) {
    %c0_i32 = arith.constant 0 : i32
    %c0_i32_0 = arith.constant 0 : i32
    return %arg1, %c0_i32 : i32, i32
  }
  func.func @transform_2(%arg0: i32, %arg1: i32) -> (i32, i32) {
    %c0_i32 = arith.constant 0 : i32
    %c0_i32_0 = arith.constant 0 : i32
    return %arg0, %c0_i32 : i32, i32
  }
}

</mosaic_0001>

<bundles_post_ra>
// kernel: tpu_custom_call.1
= control target key start
LH: loop header
LB: loop body
LE: loop exit
PB: predicated region body
PF: predicated region fallthrough
CT: control target
= control target key end

     0   :  { %s663_s9 = smov 0   ;;  %s665_s10 = smov 0   ;;  %s796_s0 = inlined_call_operand.vmem [shape: f32[16,32], index: 0, kind: input, shape index: {}]   ;;  %s797_s1 = inlined_call_operand.vmem [shape: f32[128,32], index: 1, kind: input, shape index: {}]   ;;  %s798_s2 = inlined_call_operand.vmem [shape: f32[16,1], index: 2, kind: output, shape index: {}]  }
   0x1   :  { %s667_s11 = smov 0  }
   0x2 LB: > { %s24_s12 = sadd.s32 1, %s637_s10  ;;  %p470_p0 = scmp.ge.s32.totalorder %s641_s11, 1  ;;  %s641_s11 = sphi %s667_s11, %s12_s11   ;;  %s637_s10 = sphi %s665_s10, %s803_s10   ;;  %s633_s9 = sphi %s663_s9, %s802_s9  }
   0x3   : > { %p26_p1 = scmp.ge.s32.totalorder %s24_s12, 2  ;;  %p134_p2 = scmp.lt.s32.totalorder %s641_s11, 3 }
   0x5   : > { %s805_s12 = smov (%p26_p1, %s24_s12), 0  ;;  %p135_p3 = pnand %p470_p0, %p134_p2 }
   0x6   : > { %v182_v0 = vld [vmem:[%s797_s1] sm:$0xff] (!%p135_p3)  ;;  %v183_v1 = vld [vmem:[%s797_s1 + $0x8] sm:$0xff] (!%p135_p3)  ;;  %vm198_vm0 = vcmask (!%p135_p3), 261120   ;;  %vm177_vm1 = vcmask (!%p135_p3), 7168   ;;  %v643_v2 = vmov (!%p135_p3), 0.0|0.0   ;;  %p159_p4 = scmp.lt.s32.totalorder (!%p135_p3), %s633_s9, 1 }
   0x7   : > { %138 = sbr.rel (%p135_p3) target bundleno = 898 (0x382), region = 28  ;;  %549 = vmatprep.subr.bf16.mxu0 (!%p135_p3), %v643_v2  ;;  %v550_v3 = vpack.c.bf16 (!%p135_p3), %v183_v1, %v182_v0  ;;  %vm691_vm2 = vmpackc.low (!%p135_p3), %vm198_vm0, %vm198_vm0  ;;  %v644_v5 = vmov (!%p135_p3), -inf   ;;  %v645_v6 = vmov (!%p135_p3), 0.0   ;;  %vm646_vm3 = vmmov (!%p135_p3), 0   ;;  %v184_v7 = vld [vmem:[%s797_s1 + $0x10] sm:$0xff] (!%p135_p3)  ;;  %v185_v8 = vld [vmem:[%s797_s1 + $0x18] sm:$0xff] (!%p135_p3) }
   0x8   : > { %178 = vst.msk [vmem:[#allocation2] sm:$0xff] (!%p135_p3), %vm177_vm1, %v644_v5  ;;  %179 = vst.msk [vmem:[#allocation3] sm:$0xff] (!%p135_p3), %vm177_vm1, %v645_v6  ;;  %546 = vmatprep.mubr.msk.f32.mxu0 (!%p135_p3), %vm646_vm3, %v645_v6  ;;  %v554_v9 = vpack.c.bf16 (!%p135_p3), %v185_v8, %v184_v7  ;;  %v186_v10 = vld [vmem:[%s797_s1 + $0x20] sm:$0xff] (!%p135_p3)  ;;  %v187_v11 = vld [vmem:[%s797_s1 + $0x28] sm:$0xff] (!%p135_p3)  ;;  %v647_v32 = vmov (!%p135_p3), 0  }
   0x9   : > { %552 = vmatpush3.bf16.xpose.msk.msra.mxu0 (!%p135_p3), %vm691_vm2, %v550_v3  ;;  %v558_v12 = vpack.c.bf16 (!%p135_p3), %v187_v11, %v186_v10  ;;  %v188_v13 = vld [vmem:[%s797_s1 + $0x30] sm:$0xff] (!%p135_p3)  ;;  %v189_v14 = vld [vmem:[%s797_s1 + $0x38] sm:$0xff] (!%p135_p3)  ;;  %v190_v16 = vld [vmem:[%s797_s1 + $0x40] sm:$0xff] (!%p135_p3)  ;;  %610 = vset.pattern.permute.xlu0 (!%p135_p3), %v647_v32 }
   0xa   : > { %553 = vmatprep.subr.bf16.mxu0 (!%p135_p3), %v643_v2  ;;  %v562_v15 = vpack.c.bf16 (!%p135_p3), %v189_v14, %v188_v13  ;;  %v191_v17 = vld [vmem:[%s797_s1 + $0x48] sm:$0xff] (!%p135_p3)  ;;  %v192_v19 = vld [vmem:[%s797_s1 + $0x50] sm:$0xff] (!%p135_p3)  ;;  %v193_v20 = vld [vmem:[%s797_s1 + $0x58] sm:$0xff] (!%p135_p3) }
   0xb   : > { %v566_v18 = vpack.c.bf16 (!%p135_p3), %v191_v17, %v190_v16  ;;  %v570_v21 = vpack.c.bf16 (!%p135_p3), %v193_v20, %v192_v19  ;;  %v194_v22 = vld [vmem:[%s797_s1 + $0x60] sm:$0xff] (!%p135_p3)  ;;  %v195_v23 = vld [vmem:[%s797_s1 + $0x68] sm:$0xff] (!%p135_p3)  ;;  %v196_v25 = vld [vmem:[%s797_s1 + $0x70] sm:$0xff] (!%p135_p3) }
   0xc   : > { %v574_v24 = vpack.c.bf16 (!%p135_p3), %v195_v23, %v194_v22  ;;  %v197_v26 = vld [vmem:[%s797_s1 + $0x78] sm:$0xff] (!%p135_p3) }
   0xd   : > { %v578_v27 = vpack.c.bf16 (!%p135_p3), %v197_v26, %v196_v25 }
   0xe   : > { %s701_s17 = scalar_select %p159_p4, %s633_s9, 1 }
   0xf   : > { %v320_v33 = vld [vmem:[#allocation2] sm:$0xff] }
  0x10   : > { %s471_s22 = sshll.u32 %s701_s17, 3  ;;  %s490_s17 = sshll.u32 %s633_s9, 3 }
  0x11   : > { %s715_s25 = scalar_lea.vmem %s798_s2, %s471_s22  ;;  %556 = vmatpush3.bf16.xpose.msk.msra.mxu0 %vm691_vm2, %v554_v9  ;;  %s162_s3 = scalar_lea.vmem %s796_s0, %s471_s22 }
  0x12   : > { %557 = vmatprep.subr.bf16.mxu0 %v643_v2  ;;  %v180_v28 = vld [vmem:[%s162_s3] sm:$0xff]  ;;  %s496_s22 = sadd.s32 8, %s490_s17  ;;  %p340_p5 = scmp.lt.s32.totalorder %s490_s17, 128 }
  0x13   : > { %v181_v29 = vmul.f32 14.285714, %v180_v28  ;;  %p492_p6 = scmp.gt.s32.totalorder %s496_s22, 0 }
  0x15   : > { %p775_p7 = pnand %p492_p6, %p340_p5 }
  0x16   : > { %v349_v43 = vlaneseq (!%p775_p7)  ;;  %v351_v44 = vstv (!%p775_p7), %s490_s17  ;;  %v359_v49 = vld [vmem:[#allocation3] sm:$0xff] (!%p775_p7) }
  0x18   : > { %v350_v45 = vshrl.u32 (!%p775_p7), %v349_v43, 7  ;;  %v354_v46 = vand.u32 (!%p775_p7), 127, %v349_v43 }
  0x19   : > { %560 = vmatpush3.bf16.xpose.msk.msra.mxu0 %vm691_vm2, %v558_v12 }
  0x1a   : > { %561 = vmatprep.subr.bf16.mxu0 %v643_v2  ;;  %v352_v47 = vadd.s32 (!%p775_p7), %v351_v44, %v350_v45 }
  0x1c   : > { %vm357_vm4 = vcmp.eq.s32.totalorder (!%p775_p7), %v352_v47, %v354_v46 }
  0x21   : > { %564 = vmatpush3.bf16.xpose.msk.msra.mxu0 %vm691_vm2, %v562_v15 }
  0x22   : > { %565 = vmatprep.subr.bf16.mxu0 %v643_v2 }
  0x29   : > { %568 = vmatpush3.bf16.xpose.msk.msra.mxu0 %vm691_vm2, %v566_v18 }
  0x2a   : > { %569 = vmatprep.subr.bf16.mxu0 %v643_v2 }
  0x31   : > { %572 = vmatpush3.bf16.xpose.msk.msra.mxu0 %vm691_vm2, %v570_v21 }
  0x32   : > { %573 = vmatprep.subr.bf16.mxu0 %v643_v2 }
  0x39   : > { %576 = vmatpush3.bf16.xpose.msk.msra.mxu0 %vm691_vm2, %v574_v24 }
  0x3a   : > { %577 = vmatprep.subr.bf16.mxu0 %v643_v2 }
  0x41   : > { %580 = vmatpush3.bf16.xpose.msk.msra.mxu0 %vm691_vm2, %v578_v27 }
  0x48   : > { %547 = vmatmul.mubr.msk.f32.vlgmr.msra.gmra.mrb[0].mxu0 %vm198_vm0, %v181_v29 }
 0x11b   : > { %v316_v30 = vpop.f32.mrb[0].mxu0 }
 0x11c   : > { %321 = vmax.xlane.f32.xlu0 %v316_v30  ;;  %v548_v31 = vpop.f32.mrb[1].mxu0 }
 0x1a9   : > { %v322_v34 = vpop.xlane.xlu0 %321 }
 0x1aa   : > { %v323_v35 = vmax.f32 %v320_v33, %v322_v34 }
 0x1ac   : > { %v324_v36 = vsub.f32 %v320_v33, %v323_v35  ;;  %336 = vst.msk [vmem:[#allocation2] sm:$0xff] %vm177_vm1, %v323_v35  ;;  %329 = vperm.xlu0 %610, %v323_v35  }
 0x1ae   : > { %v325_v37 = vmul.f32 1.442695, %v324_v36 }
 0x1b0   : > { %611 = vpow2.f32 %v325_v37 }
 0x1ba   : > { %v612_v38 = vpop.eup %611 }
 0x1bb   : > { %v360_v50 = vmul.f32 (!%p775_p7), %v612_v38, %v359_v49 }
 0x22b   : > { %v330_v39 = vpop.permute.xlu0 %329 }
 0x22c   : > { %v332_v40 = vsub.f32 %v316_v30, %v330_v39 }
 0x22e   : > { %v333_v41 = vmul.f32 1.442695, %v332_v40 }
 0x230   : > { %613 = vpow2.f32 %v333_v41 }
 0x234   : > { %348 = sbr.rel (%p775_p7) target bundleno = 717 (0x2cd), region = 36 }
 0x23a   : > { %v614_v42 = vpop.eup %613 }
 0x23b   : > { %v358_v48 = vsel %vm357_vm4, 0.0, %v614_v42 }
 0x23c   : > { %361 = vadd.xlane.f32.xlu0 %v358_v48 }
 0x2c9   : > { %v362_v51 = vpop.xlane.xlu0 %361 }
 0x2ca   : > { %v363_v52 = vadd.f32 %v362_v51, %v360_v50 }
 0x2cc   : > { %364 = vst.msk [vmem:[#allocation3] sm:$0xff] %vm177_vm1, %v363_v52 }
 0x2cd PF: > { %367 = sbr.rel (!%p775_p7) target bundleno = 862 (0x35e), region = 40  ;;  %370 = vadd.xlane.f32.xlu0 (%p775_p7), %v614_v42 }
 0x2d3   : > { %v368_v53 = vld [vmem:[#allocation3] sm:$0xff] (%p775_p7) }
 0x2d4   : > { %v369_v54 = vmul.f32 %v612_v38, %v368_v53 }
 0x35a   : > { %v371_v55 = vpop.xlane.xlu0 %370 }
 0x35b   : > { %v372_v56 = vadd.f32 %v371_v55, %v369_v54 }
 0x35d   : > { %373 = vst.msk [vmem:[#allocation3] sm:$0xff] %vm177_vm1, %v372_v56 }
 0x35e PF: > { %v377_v57 = vld [vmem:[#allocation2] sm:$0xff] }
 0x35f   : > { %v379_v58 = vsub.f32 0.0, %v377_v57 }
 0x361   : > { %v380_v59 = vmul.f32 1.442695, %v379_v58 }
 0x363   : > { %615 = vpow2.f32 %v380_v59 }
 0x364   : > { %v378_v61 = vld [vmem:[#allocation3] sm:$0xff] }
 0x36d   : > { %v616_v60 = vpop.eup %615 }
 0x36e   : > { %v382_v62 = vmul.f32 112.0, %v616_v60 }
 0x370   : > { %v383_v63 = vsub.f32 %v378_v61, %v382_v62 }
 0x372   : > { %617 = vlog2.f32 %v383_v63 }
 0x37c   : > { %v618_v0 = vpop.eup %617 }
 0x37d   : > { %v385_v1 = vmul.f32 0.6931472, %v618_v0 }
 0x37f   : > { %v386_v2 = vadd.f32 %v385_v1, %v377_v57 }
 0x381   : > { %387 = vst.msk [vmem:[%s715_s25] sm:$0xff] %vm177_vm1, %v386_v2 }
 0x382 PF: > { %s12_s11 = sadd.s32 1, %s641_s11   ;;  %s802_s9 = smov %s637_s10 }
 0x383   : > { %p9_p8 = scmp.ge.s32.totalorder %s12_s11, 4   ;;  %s803_s10 = smov %s805_s12 }
 0x385   :  { %11 = sbr.rel (!%p9_p8) target bundleno = 2 (0x2), region = 77 }

</bundles_post_ra>
